<compile_context>
chip_gen: v7x
topology: tpu7x:2x2x1
jax: 0.10.0
libtpu: 0.0.40
codegen_flags: <defaults>
</compile_context>

<pallas_src>
import functools

import jax
import jax.numpy as jnp
from jax.experimental import pallas as pl
from jax.experimental.pallas import tpu as pltpu

IMAGE_SIZE = 784
HIDDEN_SIZE = 256


def _round_up(v, m):
    return ((v + m - 1) // m) * m


def _leaky_relu(x, slope=0.2):
    return jnp.where(x > 0, x, slope * x)


def d_kernel(x_ref, w1_ref, b1_ref, w2_ref, b2_ref, w3_ref, b3_ref, o_ref):
    # bf16 MXU operands, f32 accumulation.  If x already arrives as bf16 the
    # astype is a no-op; if it arrives as f32 it is a VPU cast.
    xb = x_ref[...].astype(jnp.bfloat16)                                # (TB, 784)
    h1 = jnp.dot(xb, w1_ref[...], preferred_element_type=jnp.float32)   # MXU, f32 acc
    h1 = _leaky_relu(h1 + b1_ref[...])                                  # (TB, 256) f32
    h2 = jnp.dot(h1.astype(jnp.bfloat16), w2_ref[...],
                 preferred_element_type=jnp.float32)                    # MXU, f32 acc
    h2 = _leaky_relu(h2 + b2_ref[...])                                  # (TB, 256) f32
    # Layer 3 has out_features == 1: VPU multiply + lane reduction (XLU)
    # instead of a 127/128-wasted padded MXU matmul.  (Re-check on the bundle
    # dump once bf16 frees the MXU; only move back to MXU if XLU binds.)
    h3 = jnp.sum(h2 * w3_ref[...], axis=-1, keepdims=True) + b3_ref[...]   # (TB, 1)
    # Exact sigmoid (no approx reciprocal) to stay close to the f32 reference.
    o_ref[...] = 1.0 / (1.0 + jnp.exp(-h3))


@functools.partial(jax.jit, static_argnames=("tile_b",))
def discriminator_forward(x, params, tile_b=1024):
    """x: (B, 784) bf16 (preferred) or f32.  Returns (B, 1) f32 = sigmoid(D(x))."""
    w1, b1, w2, b2, w3_row, b3 = params
    B = x.shape[0]
    assert tile_b % 8 == 0, "tile_b must be a multiple of 8 (sublane tiling)"

    # Adaptive batch tile: never pad a small batch up to a huge tile.
    eff_tile = min(tile_b, _round_up(B, 16))
    # Keep >= 2 grid steps for dual-TensorCore chips (v7x megacore sharding)
    # once the batch is big enough that splitting keeps the MXU M-dim >= 256.
    if B >= 512:
        eff_tile = min(eff_tile, _round_up(pl.cdiv(B, 2), 256))

    b_pad = pl.cdiv(B, eff_tile) * eff_tile
    if b_pad != B:
        # Only fires when B is not a multiple of eff_tile (a <16-row pad for
        # small batches thanks to adaptive tiling).
        x = jnp.pad(x, ((0, b_pad - B), (0, 0)))

    grid = (b_pad // eff_tile,)

    flops = 2 * b_pad * (IMAGE_SIZE * HIDDEN_SIZE
                         + HIDDEN_SIZE * HIDDEN_SIZE
                         + HIDDEN_SIZE)
    bytes_accessed = (b_pad * IMAGE_SIZE * x.dtype.itemsize            # x read
                      + 2 * (IMAGE_SIZE * HIDDEN_SIZE                  # w1 (bf16)
                             + HIDDEN_SIZE * HIDDEN_SIZE)              # w2 (bf16)
                      + 4 * (3 * HIDDEN_SIZE + 1)                      # b1, b2, w3, b3
                      + 4 * b_pad)                                     # output write
    cost = pl.CostEstimate(flops=flops, transcendentals=b_pad,
                           bytes_accessed=bytes_accessed)

    out = pl.pallas_call(
        d_kernel,
        out_shape=jax.ShapeDtypeStruct((b_pad, 1), jnp.float32),
        grid_spec=pltpu.PrefetchScalarGridSpec(
            num_scalar_prefetch=0,
            grid=grid,
            in_specs=[
                pl.BlockSpec((eff_tile, IMAGE_SIZE), lambda i: (i, 0)),      # x tile
                pl.BlockSpec((IMAGE_SIZE, HIDDEN_SIZE), lambda i: (0, 0)),   # w1 (resident)
                pl.BlockSpec((1, HIDDEN_SIZE), lambda i: (0, 0)),            # b1
                pl.BlockSpec((HIDDEN_SIZE, HIDDEN_SIZE), lambda i: (0, 0)),  # w2 (resident)
                pl.BlockSpec((1, HIDDEN_SIZE), lambda i: (0, 0)),            # b2
                pl.BlockSpec((1, HIDDEN_SIZE), lambda i: (0, 0)),            # w3 row
                pl.BlockSpec((1, 1), lambda i: (0, 0)),                      # b3
            ],
            out_specs=pl.BlockSpec((eff_tile, 1), lambda i: (i, 0)),
        ),
        compiler_params=pltpu.CompilerParams(
            dimension_semantics=("parallel",),
            vmem_limit_bytes=32 * 1024 * 1024),
        cost_estimate=cost,
    )(x, w1, b1, w2, b2, w3_row, b3)

    return out[:B]


def init_params(key):
    """Parameters in kernel-ready layout, built once.

    PyTorch nn.Linear stores weights as (out, in); we keep the transpose
    (in, out) so the kernel computes x @ W on the MXU.  w1/w2 are stored in
    bf16 (MXU operand dtype); biases and the layer-3 row (VPU path) stay f32.
    """
    k1, k2, k3, k4, k5, k6 = jax.random.split(key, 6)

    def uni(k, shape, fan_in):
        bound = 1.0 / jnp.sqrt(fan_in)
        return jax.random.uniform(k, shape, jnp.float32, -bound, bound)

    w1 = uni(k1, (IMAGE_SIZE, HIDDEN_SIZE), IMAGE_SIZE).astype(jnp.bfloat16)
    b1 = uni(k2, (1, HIDDEN_SIZE), IMAGE_SIZE)
    w2 = uni(k3, (HIDDEN_SIZE, HIDDEN_SIZE), HIDDEN_SIZE).astype(jnp.bfloat16)
    b2 = uni(k4, (1, HIDDEN_SIZE), HIDDEN_SIZE)
    w3_row = uni(k5, (1, HIDDEN_SIZE), HIDDEN_SIZE)   # layer3 weight, row form (f32)
    b3 = uni(k6, (1, 1), HIDDEN_SIZE)
    return (w1, b1, w2, b2, w3_row, b3)


def reference_forward(x, params):
    """Matching-precision reference: bf16 MXU matmuls, f32 accumulation/epilogue."""
    w1, b1, w2, b2, w3_row, b3 = params
    h = jnp.dot(x.astype(jnp.bfloat16), w1,
                preferred_element_type=jnp.float32) + b1
    h = jnp.where(h > 0, h, 0.2 * h)
    h = jnp.dot(h.astype(jnp.bfloat16), w2,
                preferred_element_type=jnp.float32) + b2
    h = jnp.where(h > 0, h, 0.2 * h)
    h = jnp.dot(h, w3_row.T) + b3          # f32 VPU-equivalent path
    return jax.nn.sigmoid(h)


if __name__ == "__main__":
    key = jax.random.PRNGKey(0)
    kp, kx = jax.random.split(key)
    params = init_params(kp)

    B = 16  # small demo batch; adaptive tiling -> eff_tile=16, no padding
    x = jax.random.normal(kx, (B, IMAGE_SIZE), jnp.float32)
    # Store activations in bf16 in HBM so the dominant x DMA is half-width.
    x_bf16 = x.astype(jnp.bfloat16)

    out = discriminator_forward(x_bf16, params)
    out = jax.block_until_ready(out)

    ref = reference_forward(x_bf16, params)
    assert out.shape == (B, 1), out.shape
    assert jnp.allclose(out, ref, atol=2e-3, rtol=2e-3), (
        float(jnp.max(jnp.abs(out - ref))))

    print("KERNEL_OK")
</pallas_src>

<mosaic_0001>
module attributes {stable_mosaic.version = 11 : i64} {
  func.func @d_kernel(%arg0: i32, %arg1: memref<16x784xbf16, #tpu.memory_space<vmem>>, %arg2: memref<784x256xbf16, #tpu.memory_space<vmem>>, %arg3: memref<1x256xf32, #tpu.memory_space<vmem>>, %arg4: memref<256x256xbf16, #tpu.memory_space<vmem>>, %arg5: memref<1x256xf32, #tpu.memory_space<vmem>>, %arg6: memref<1x256xf32, #tpu.memory_space<vmem>>, %arg7: memref<1x1xf32, #tpu.memory_space<vmem>>, %arg8: memref<16x1xf32, #tpu.memory_space<vmem>>) attributes {dimension_semantics = [#tpu.dimension_semantics<parallel>], iteration_bounds = array<i64: 1>, scalar_prefetch = 0 : i64, scratch_operands = 0 : i64, tpu.core_type = #tpu.core_type<tc>, window_params = [{transform_indices = @transform_0, window_bounds = array<i64: 16, 784>}, {pipeline_mode = #tpu.pipeline_mode<synchronous>, transform_indices = @transform_1, window_bounds = array<i64: 784, 256>}, {pipeline_mode = #tpu.pipeline_mode<synchronous>, transform_indices = @transform_2, window_bounds = array<i64: 1, 256>}, {pipeline_mode = #tpu.pipeline_mode<synchronous>, transform_indices = @transform_3, window_bounds = array<i64: 256, 256>}, {pipeline_mode = #tpu.pipeline_mode<synchronous>, transform_indices = @transform_4, window_bounds = array<i64: 1, 256>}, {pipeline_mode = #tpu.pipeline_mode<synchronous>, transform_indices = @transform_5, window_bounds = array<i64: 1, 256>}, {pipeline_mode = #tpu.pipeline_mode<synchronous>, transform_indices = @transform_6, window_bounds = array<i64: 1, 1>}, {transform_indices = @transform_7, window_bounds = array<i64: 16, 1>}]} {
    %c0 = arith.constant 0 : index
    %c0_0 = arith.constant 0 : index
    %0 = vector.load %arg1[%c0, %c0_0] : memref<16x784xbf16, #tpu.memory_space<vmem>>, vector<16x784xbf16>
    %c0_1 = arith.constant 0 : index
    %c0_2 = arith.constant 0 : index
    %1 = vector.load %arg2[%c0_1, %c0_2] : memref<784x256xbf16, #tpu.memory_space<vmem>>, vector<784x256xbf16>
    %cst = arith.constant dense<0.000000e+00> : vector<16x256xf32>
    %2 = tpu.matmul %0, %1, %cst {dimension_numbers = #tpu.dot_dimension_numbers<[1], [0], [0], [1], [0, 0, 1, 1], [], []>} : vector<16x784xbf16>, vector<784x256xbf16>, vector<16x256xf32> -> vector<16x256xf32>
    %c0_3 = arith.constant 0 : index
    %c0_4 = arith.constant 0 : index
    %3 = vector.load %arg3[%c0_3, %c0_4] : memref<1x256xf32, #tpu.memory_space<vmem>>, vector<1x256xf32>
    %4 = vector.broadcast %3 : vector<1x256xf32> to vector<16x256xf32>
    %5 = arith.addf %2, %4 : vector<16x256xf32>
    %cst_5 = arith.constant 0.000000e+00 : f32
    %6 = vector.broadcast %cst_5 : f32 to vector<16x256xf32>
    %7 = arith.cmpf ogt, %5, %6 : vector<16x256xf32>
    %cst_6 = arith.constant 2.000000e-01 : f32
    %8 = vector.broadcast %cst_6 : f32 to vector<16x256xf32>
    %9 = arith.mulf %8, %5 : vector<16x256xf32>
    %10 = arith.select %7, %5, %9 : vector<16x256xi1>, vector<16x256xf32>
    %11 = arith.truncf %10 : vector<16x256xf32> to vector<16x256xbf16>
    %c0_7 = arith.constant 0 : index
    %c0_8 = arith.constant 0 : index
    %12 = vector.load %arg4[%c0_7, %c0_8] : memref<256x256xbf16, #tpu.memory_space<vmem>>, vector<256x256xbf16>
    %cst_9 = arith.constant dense<0.000000e+00> : vector<16x256xf32>
    %13 = tpu.matmul %11, %12, %cst_9 {dimension_numbers = #tpu.dot_dimension_numbers<[1], [0], [0], [1], [0, 0, 1, 1], [], []>} : vector<16x256xbf16>, vector<256x256xbf16>, vector<16x256xf32> -> vector<16x256xf32>
    %c0_10 = arith.constant 0 : index
    %c0_11 = arith.constant 0 : index
    %14 = vector.load %arg5[%c0_10, %c0_11] : memref<1x256xf32, #tpu.memory_space<vmem>>, vector<1x256xf32>
    %15 = vector.broadcast %14 : vector<1x256xf32> to vector<16x256xf32>
    %16 = arith.addf %13, %15 : vector<16x256xf32>
    %cst_12 = arith.constant 0.000000e+00 : f32
    %17 = vector.broadcast %cst_12 : f32 to vector<16x256xf32>
    %18 = arith.cmpf ogt, %16, %17 : vector<16x256xf32>
    %cst_13 = arith.constant 2.000000e-01 : f32
    %19 = vector.broadcast %cst_13 : f32 to vector<16x256xf32>
    %20 = arith.mulf %19, %16 : vector<16x256xf32>
    %21 = arith.select %18, %16, %20 : vector<16x256xi1>, vector<16x256xf32>
    %c0_14 = arith.constant 0 : index
    %c0_15 = arith.constant 0 : index
    %22 = vector.load %arg6[%c0_14, %c0_15] : memref<1x256xf32, #tpu.memory_space<vmem>>, vector<1x256xf32>
    %23 = vector.broadcast %22 : vector<1x256xf32> to vector<16x256xf32>
    %24 = arith.mulf %21, %23 : vector<16x256xf32>
    %cst_16 = arith.constant dense<0.000000e+00> : vector<16xf32>
    %25 = vector.multi_reduction <add>, %24, %cst_16 [1] : vector<16x256xf32> to vector<16xf32>
    %26 = vector.shape_cast %25 : vector<16xf32> to vector<16x1xf32>
    %c0_17 = arith.constant 0 : index
    %c0_18 = arith.constant 0 : index
    %27 = vector.load %arg7[%c0_17, %c0_18] : memref<1x1xf32, #tpu.memory_space<vmem>>, vector<1x1xf32>
    %28 = vector.broadcast %27 : vector<1x1xf32> to vector<16x1xf32>
    %29 = arith.addf %26, %28 : vector<16x1xf32>
    %cst_19 = arith.constant 0.000000e+00 : f32
    %30 = vector.broadcast %cst_19 : f32 to vector<16x1xf32>
    %31 = arith.subf %30, %29 : vector<16x1xf32>
    %32 = math.exp %31 : vector<16x1xf32>
    %cst_20 = arith.constant 1.000000e+00 : f32
    %33 = vector.broadcast %cst_20 : f32 to vector<16x1xf32>
    %34 = arith.addf %33, %32 : vector<16x1xf32>
    %cst_21 = arith.constant 1.000000e+00 : f32
    %35 = vector.broadcast %cst_21 : f32 to vector<16x1xf32>
    %36 = arith.divf %35, %34 : vector<16x1xf32>
    %c0_22 = arith.constant 0 : index
    %c0_23 = arith.constant 0 : index
    %37 = vector.load %arg8[%c0_22, %c0_23] : memref<16x1xf32, #tpu.memory_space<vmem>>, vector<16x1xf32>
    tpu.vector_store %arg8[%c0_22, %c0_23], %36 {strides = array<i32>} : memref<16x1xf32, #tpu.memory_space<vmem>>, vector<16x1xf32>,
    return
  }
  func.func @transform_0(%arg0: i32) -> (i32, i32) {
    %c0_i32 = arith.constant 0 : i32
    %c0_i32_0 = arith.constant 0 : i32
    return %arg0, %c0_i32 : i32, i32
  }
  func.func @transform_1(%arg0: i32) -> (i32, i32) {
    %c0_i32 = arith.constant 0 : i32
    %c0_i32_0 = arith.constant 0 : i32
    %c0_i32_1 = arith.constant 0 : i32
    return %c0_i32, %c0_i32_0 : i32, i32
  }
  func.func @transform_2(%arg0: i32) -> (i32, i32) {
    %c0_i32 = arith.constant 0 : i32
    %c0_i32_0 = arith.constant 0 : i32
    %c0_i32_1 = arith.constant 0 : i32
    return %c0_i32, %c0_i32_0 : i32, i32
  }
  func.func @transform_3(%arg0: i32) -> (i32, i32) {
    %c0_i32 = arith.constant 0 : i32
    %c0_i32_0 = arith.constant 0 : i32
    %c0_i32_1 = arith.constant 0 : i32
    return %c0_i32, %c0_i32_0 : i32, i32
  }
  func.func @transform_4(%arg0: i32) -> (i32, i32) {
    %c0_i32 = arith.constant 0 : i32
    %c0_i32_0 = arith.constant 0 : i32
    %c0_i32_1 = arith.constant 0 : i32
    return %c0_i32, %c0_i32_0 : i32, i32
  }
  func.func @transform_5(%arg0: i32) -> (i32, i32) {
    %c0_i32 = arith.constant 0 : i32
    %c0_i32_0 = arith.constant 0 : i32
    %c0_i32_1 = arith.constant 0 : i32
    return %c0_i32, %c0_i32_0 : i32, i32
  }
  func.func @transform_6(%arg0: i32) -> (i32, i32) {
    %c0_i32 = arith.constant 0 : i32
    %c0_i32_0 = arith.constant 0 : i32
    %c0_i32_1 = arith.constant 0 : i32
    return %c0_i32, %c0_i32_0 : i32, i32
  }
  func.func @transform_7(%arg0: i32) -> (i32, i32) {
    %c0_i32 = arith.constant 0 : i32
    %c0_i32_0 = arith.constant 0 : i32
    return %arg0, %c0_i32 : i32, i32
  }
}

</mosaic_0001>

<bundles_post_ra>
// kernel: discriminator_forward.1
= control target key start
LH: loop header
LB: loop body
LE: loop exit
PB: predicated region body
PF: predicated region fallthrough
CT: control target
= control target key end

     0   :  { %s1768_s0 = inlined_call_operand.hbm [shape: bf16[16,784], index: 0, kind: input, shape index: {}]   ;;  %s1769_s1 = inlined_call_operand.hbm [shape: bf16[784,256], index: 1, kind: input, shape index: {}]   ;;  %s1770_s2 = inlined_call_operand.vmem [shape: f32[1,256], index: 2, kind: input, shape index: {}]   ;;  %s1771_s3 = inlined_call_operand.hbm [shape: bf16[256,256], index: 3, kind: input, shape index: {}]   ;;  %s1772_s4 = inlined_call_operand.vmem [shape: f32[1,256], index: 4, kind: input, shape index: {}]   ;;  %s1773_s5 = inlined_call_operand.vmem [shape: f32[1,256], index: 5, kind: input, shape index: {}]   ;;  %s1774_s6 = inlined_call_operand.<no memory space> [shape: f32[1,1], index: 6, kind: input, shape index: {}]   ;;  %s1775_s7 = inlined_call_operand.vmem [shape: f32[16,1], index: 7, kind: output, shape index: {}]  }
   0x1   :  { %v12_v0 = vstv %s1774_s6 }
   0x2   :  { %13 = vst [vmem:[#allocation2] sm:$0x1] %v12_v0 }
   0x3   :  { %14 = vsyncpa [#allocation4], 0 }
   0x4   :  { %15 = vsyncpa [#allocation6], 0  ;;  %s1660_s26 = smov [#allocation5]   ;;  %s1590_s30 = scalar_lea.hbm %s1769_s1, 12544 }
   0x5   :  { %s33_s27 = sshll.u32 %s1660_s26, 4  ;;  %p1591_p0 = scmp.ne.s32.totalorder %s1769_s1, %s1590_s30  ;;  %s34_s27 = int_to_ptr.vmem [resolvable:$true] %s33_s27 }
   0x6   :  { %p1594_p1 = scmp.lt.u32.totalorder %s1590_s30, %s1769_s1 }
   0x8   :  { %p1596_p2 = pnand %p1594_p1, %p1591_p0 }
   0xa   :  { %1599 = shalt.err (!%p1596_p2)
}
   0xb   :  { %s1600_s6 = scalar_lea.vmem %s34_s27, 12544  ;;  %p1605_p4 = scmp.lt.s32.totalorder %s34_s27, %s34_s27 }
   0xc   :  { %p1601_p3 = scmp.ne.s32.totalorder %s34_s27, %s1600_s6  ;;  %p1606_p5 = scmp.lt.s32.totalorder %s1600_s6, %s1600_s6 }
   0xe   :  { %p1607_p6 = por %p1606_p5, %p1605_p4 }
  0x10   :  { %p1608_p7 = pnand %p1607_p6, %p1601_p3 }
  0x12   :  { %1611 = shalt.err (!%p1608_p7)
}
  0x13   :  { %s1661_s12 = smov 128   ;;  %s1662_s13 = smov 8  }
  0x14   :  { %39 = dma.hbm_to_vmem [thread:$0]  %s1769_s1, 12544, %s34_s27, [#allocation6], %s1661_s12, %s1661_s12, %s1662_s13  }
  0x15   :  { %s1663_s16 = smov [#allocation3]   ;;  %s1612_s20 = scalar_lea.hbm %s1768_s0, 896 }
  0x16   :  { %s21_s17 = sshll.u32 %s1663_s16, 4  ;;  %p1613_p8 = scmp.ne.s32.totalorder %s1768_s0, %s1612_s20  ;;  %s22_s17 = int_to_ptr.vmem [resolvable:$true] %s21_s17 }
  0x17   :  { %p1616_p9 = scmp.lt.u32.totalorder %s1612_s20, %s1768_s0 }
  0x19   :  { %p1618_p10 = pnand %p1616_p9, %p1613_p8 }
  0x1b   :  { %1621 = shalt.err (!%p1618_p10)
}
  0x1c   :  { %s1622_s25 = scalar_lea.vmem %s22_s17, 896  ;;  %p1627_p12 = scmp.lt.s32.totalorder %s22_s17, %s22_s17 }
  0x1d   :  { %p1623_p11 = scmp.ne.s32.totalorder %s22_s17, %s1622_s25  ;;  %p1628_p13 = scmp.lt.s32.totalorder %s1622_s25, %s1622_s25 }
  0x1f   :  { %p1629_p0 = por %p1628_p13, %p1627_p12 }
  0x21   :  { %p1630_p1 = pnand %p1629_p0, %p1623_p11 }
  0x23   :  { %1633 = shalt.err (!%p1630_p1)
}
  0x24   :  { %s1664_s1 = smov 448   ;;  %s1665_s26 = smov 28  }
  0x25   :  { %27 = dma.hbm_to_vmem [thread:$0]  %s1768_s0, 896, %s22_s17, [#allocation4], %s1664_s1, %s1664_s1, %s1665_s26  }
  0x26   :  { %s1666_s29 = smov [#allocation7]   ;;  %s1634_s10 = scalar_lea.hbm %s1771_s3, 4096 }
  0x27   :  { %s47_s30 = sshll.u32 %s1666_s29, 4  ;;  %p1635_p2 = scmp.ne.s32.totalorder %s1771_s3, %s1634_s10  ;;  %s48_s30 = int_to_ptr.vmem [resolvable:$true] %s47_s30 }
  0x28   :  { %p1638_p3 = scmp.lt.u32.totalorder %s1634_s10, %s1771_s3 }
  0x2a   :  { %p1640_p4 = pnand %p1638_p3, %p1635_p2 }
  0x2c   :  { %1643 = shalt.err (!%p1640_p4)
}
  0x2d   :  { %s1644_s16 = scalar_lea.vmem %s48_s30, 4096  ;;  %p1649_p6 = scmp.lt.s32.totalorder %s48_s30, %s48_s30 }
  0x2e   :  { %p1645_p5 = scmp.ne.s32.totalorder %s48_s30, %s1644_s16  ;;  %p1650_p7 = scmp.lt.s32.totalorder %s1644_s16, %s1644_s16 }
  0x30   :  { %p1651_p8 = por %p1650_p7, %p1649_p6 }
  0x32   :  { %p1652_p9 = pnand %p1651_p8, %p1645_p5 }
  0x34   :  { %1655 = shalt.err (!%p1652_p9)
}
  0x35   :  { %53 = dma.hbm_to_vmem [thread:$0]  %s1771_s3, 4096, %s48_s30, [#allocation6], %s1661_s12, %s1661_s12, %s1662_s13  }
  0x36   :  { %1656 = dma.done.wait [#allocation4], 896  }
  0x37   :  { %1657 = vsyncadd [#allocation4], 4294966400 }
  0x38   :  { %1658 = dma.done.wait [#allocation6], 16640  }
  0x39   :  { %1659 = vsyncadd [#allocation6], 4294950656  ;;  %v1377_v1 = vld [vmem:[#allocation5 + $0x104] ss:$8 sps:$4 sm:$0xff]   ;;  %v1379_v2 = vld [vmem:[#allocation5 + $0x100] ss:$8 sps:$4 sm:$0xff]  }
  0x3a   :  { %760 = vmatprep.subr.bf16.mxu0 %v1377_v1  ;;  %v1380_v3 = vld [vmem:[#allocation5 + $0x114] ss:$8 sps:$4 sm:$0xff]   ;;  %v1382_v4 = vld [vmem:[#allocation5 + $0x110] ss:$8 sps:$4 sm:$0xff]   ;;  %v1383_v5 = vld [vmem:[#allocation5 + $0x124] ss:$8 sps:$4 sm:$0xff]  }
  0x3b   :  { %761 = vmatpush1.bf16.msra.mxu0 %v1379_v2  ;;  %v1385_v6 = vld [vmem:[#allocation5 + $0x120] ss:$8 sps:$4 sm:$0xff]   ;;  %v1386_v7 = vld [vmem:[#allocation5 + $0x134] ss:$8 sps:$4 sm:$0xff]   ;;  %v1388_v8 = vld [vmem:[#allocation5 + $0x130] ss:$8 sps:$4 sm:$0xff]  }
  0x3c   :  { %762 = vmatprep.subr.bf16.mxu0 %v1380_v3  ;;  %v1389_v9 = vld [vmem:[#allocation5 + $0x144] ss:$8 sps:$4 sm:$0xff]   ;;  %v1391_v10 = vld [vmem:[#allocation5 + $0x140] ss:$8 sps:$4 sm:$0xff]   ;;  %v1392_v11 = vld [vmem:[#allocation5 + $0x154] ss:$8 sps:$4 sm:$0xff]  }
  0x3d   :  { %v1394_v12 = vld [vmem:[#allocation5 + $0x150] ss:$8 sps:$4 sm:$0xff]   ;;  %v1395_v13 = vld [vmem:[#allocation5 + $0x164] ss:$8 sps:$4 sm:$0xff]   ;;  %v1397_v15 = vld [vmem:[#allocation5 + $0x160] ss:$8 sps:$4 sm:$0xff]  }
  0x3e   :  { %v1427_v14 = vld [vmem:[#allocation3 + $0xc] ss:$28 sps:$4 sm:$0xff]   ;;  %v1434_v17 = vld [vmem:[#allocation5 + $0x4] ss:$8 sps:$4 sm:$0xff]   ;;  %v1439_v20 = vld [vmem:[#allocation5] ss:$8 sps:$4 sm:$0xff]  }
  0x3f   :  { %763 = vmatpush1.bf16.msra.mxu0 %v1382_v4  ;;  %v1398_v16 = vld [vmem:[#allocation5 + $0x174] ss:$8 sps:$4 sm:$0xff]   ;;  %792 = vmatprep.mubr.bf16.mxu0 %v1427_v14  ;;  %v1400_v18 = vld [vmem:[#allocation5 + $0x170] ss:$8 sps:$4 sm:$0xff]   ;;  %v1401_v19 = vld [vmem:[#allocation5 + $0x184] ss:$8 sps:$4 sm:$0xff]  }
  0x40   :  { %764 = vmatprep.subr.bf16.mxu0 %v1383_v5  ;;  %717 = vmatprep.subr.bf16.mxu1 %v1434_v17  ;;  %v1440_v21 = vld [vmem:[#allocation5 + $0x14] ss:$8 sps:$4 sm:$0xff]   ;;  %v1403_v22 = vld [vmem:[#allocation5 + $0x180] ss:$8 sps:$4 sm:$0xff]   ;;  %v1445_v23 = vld [vmem:[#allocation5 + $0x10] ss:$8 sps:$4 sm:$0xff]  }
  0x41   :  { %718 = vmatpush1.bf16.msra.mxu1 %v1439_v20  ;;  %v1446_v24 = vld [vmem:[#allocation5 + $0x24] ss:$8 sps:$4 sm:$0xff]   ;;  %v1404_v25 = vld [vmem:[#allocation5 + $0x194] ss:$8 sps:$4 sm:$0xff]   ;;  %v1451_v26 = vld [vmem:[#allocation5 + $0x20] ss:$8 sps:$4 sm:$0xff]  }
  0x42   :  { %719 = vmatprep.subr.bf16.mxu1 %v1440_v21  ;;  %v1452_v27 = vld [vmem:[#allocation5 + $0x34] ss:$8 sps:$4 sm:$0xff]   ;;  %v1406_v28 = vld [vmem:[#allocation5 + $0x190] ss:$8 sps:$4 sm:$0xff]   ;;  %v1407_v29 = vld [vmem:[#allocation5 + $0x1a4] ss:$8 sps:$4 sm:$0xff]  }
  0x43   :  { %765 = vmatpush1.bf16.msra.mxu0 %v1385_v6  ;;  %v1457_v30 = vld [vmem:[#allocation5 + $0x30] ss:$8 sps:$4 sm:$0xff]   ;;  %v1458_v31 = vld [vmem:[#allocation5 + $0x44] ss:$8 sps:$4 sm:$0xff]   ;;  %v1409_v32 = vld [vmem:[#allocation5 + $0x1a0] ss:$8 sps:$4 sm:$0xff]  }
  0x44   :  { %766 = vmatprep.subr.bf16.mxu0 %v1386_v7  ;;  %v1410_v33 = vld [vmem:[#allocation5 + $0x1b4] ss:$8 sps:$4 sm:$0xff]   ;;  %v1463_v34 = vld [vmem:[#allocation5 + $0x40] ss:$8 sps:$4 sm:$0xff]   ;;  %v1412_v36 = vld [vmem:[#allocation5 + $0x1b0] ss:$8 sps:$4 sm:$0xff]  }
  0x45   :  { %720 = vmatpush1.bf16.msra.mxu1 %v1445_v23  ;;  %v1464_v35 = vld [vmem:[#allocation5 + $0x54] ss:$8 sps:$4 sm:$0xff]   ;;  %v1413_v37 = vld [vmem:[#allocation5 + $0x1c4] ss:$8 sps:$4 sm:$0xff]   ;;  %v1469_v38 = vld [vmem:[#allocation5 + $0x50] ss:$8 sps:$4 sm:$0xff]  }
  0x46   :  { %721 = vmatprep.subr.bf16.mxu1 %v1446_v24  ;;  %v1470_v39 = vld [vmem:[#allocation5 + $0x64] ss:$8 sps:$4 sm:$0xff]   ;;  %v1415_v40 = vld [vmem:[#allocation5 + $0x1c0] ss:$8 sps:$4 sm:$0xff]   ;;  %v1416_v41 = vld [vmem:[#allocation5 + $0x1d4] ss:$8 sps:$4 sm:$0xff]  }
  0x47   :  { %767 = vmatpush1.bf16.msra.mxu0 %v1388_v8  ;;  %v1475_v42 = vld [vmem:[#allocation5 + $0x60] ss:$8 sps:$4 sm:$0xff]   ;;  %v1476_v43 = vld [vmem:[#allocation5 + $0x74] ss:$8 sps:$4 sm:$0xff]   ;;  %v1418_v44 = vld [vmem:[#allocation5 + $0x1d0] ss:$8 sps:$4 sm:$0xff]  }
  0x48   :  { %768 = vmatprep.subr.bf16.mxu0 %v1389_v9  ;;  %v1419_v45 = vld [vmem:[#allocation5 + $0x1e4] ss:$8 sps:$4 sm:$0xff]   ;;  %v1481_v46 = vld [vmem:[#allocation5 + $0x70] ss:$8 sps:$4 sm:$0xff]   ;;  %v1421_v48 = vld [vmem:[#allocation5 + $0x1e0] ss:$8 sps:$4 sm:$0xff]  }
  0x49   :  { %722 = vmatpush1.bf16.msra.mxu1 %v1451_v26  ;;  %v1482_v47 = vld [vmem:[#allocation5 + $0x84] ss:$8 sps:$4 sm:$0xff]   ;;  %v1422_v49 = vld [vmem:[#allocation5 + $0x1f4] ss:$8 sps:$4 sm:$0xff]   ;;  %v1487_v50 = vld [vmem:[#allocation5 + $0x80] ss:$8 sps:$4 sm:$0xff]  }
  0x4a   :  { %723 = vmatprep.subr.bf16.mxu1 %v1452_v27  ;;  %v1488_v51 = vld [vmem:[#allocation5 + $0x94] ss:$8 sps:$4 sm:$0xff]   ;;  %v1424_v52 = vld [vmem:[#allocation5 + $0x1f0] ss:$8 sps:$4 sm:$0xff]   ;;  %v1430_v53 = vld [vmem:[#allocation5 + $0x204] ss:$8 sps:$4 sm:$0xff]  }
  0x4b   :  { %769 = vmatpush1.bf16.msra.mxu0 %v1391_v10  ;;  %v1493_v54 = vld [vmem:[#allocation5 + $0x90] ss:$8 sps:$4 sm:$0xff]   ;;  %v1494_v56 = vld [vmem:[#allocation5 + $0xa4] ss:$8 sps:$4 sm:$0xff]   ;;  %v1428_v57 = vld [vmem:[#allocation5 + $0x200] ss:$8 sps:$4 sm:$0xff]  }
  0x4c   :  { %770 = vmatprep.subr.bf16.mxu0 %v1392_v11  ;;  %v1425_v55 = vld [vmem:[#allocation3 + $0x8] ss:$28 sps:$4 sm:$0xff]   ;;  %v1520_v58 = vld [vmem:[#allocation3 + $0x14] ss:$28 sps:$4 sm:$0xff]   ;;  %v1499_v60 = vld [vmem:[#allocation5 + $0xa0] ss:$8 sps:$4 sm:$0xff]  }
  0x4d   :  { %724 = vmatpush1.bf16.msra.mxu1 %v1457_v30  ;;  %v1433_v59 = vld [vmem:[#allocation5 + $0x214] ss:$8 sps:$4 sm:$0xff]   ;;  %v1431_v62 = vld [vmem:[#allocation5 + $0x210] ss:$8 sps:$4 sm:$0xff]   ;;  %v1438_v63 = vld [vmem:[#allocation5 + $0x224] ss:$8 sps:$4 sm:$0xff]  }
  0x4e   :  { %725 = vmatprep.subr.bf16.mxu1 %v1458_v31  ;;  %v1500_v61 = vld [vmem:[#allocation5 + $0xb4] ss:$8 sps:$4 sm:$0xff]   ;;  %v1505_v0 = vld [vmem:[#allocation5 + $0xb0] ss:$8 sps:$4 sm:$0xff]   ;;  %v1532_v1 = vld [vmem:[#allocation3 + $0x4] ss:$28 sps:$4 sm:$0xff]  }
  0x4f   :  { %771 = vmatpush1.bf16.msra.mxu0 %v1394_v12  ;;  %v1506_v2 = vld [vmem:[#allocation5 + $0xc4] ss:$8 sps:$4 sm:$0xff]   ;;  %v1436_v3 = vld [vmem:[#allocation5 + $0x220] ss:$8 sps:$4 sm:$0xff]   ;;  %749 = vmatprep.mubr.bf16.mxu1 %v1532_v1  ;;  %v1444_v4 = vld [vmem:[#allocation5 + $0x234] ss:$8 sps:$4 sm:$0xff]  }
  0x50   :  { %772 = vmatprep.subr.bf16.mxu0 %v1395_v13  ;;  %v1511_v5 = vld [vmem:[#allocation5 + $0xc0] ss:$8 sps:$4 sm:$0xff]   ;;  %v1512_v6 = vld [vmem:[#allocation5 + $0xd4] ss:$8 sps:$4 sm:$0xff]   ;;  %v1442_v7 = vld [vmem:[#allocation5 + $0x230] ss:$8 sps:$4 sm:$0xff]  }
  0x51   :  { %726 = vmatpush1.bf16.msra.mxu1 %v1463_v34  ;;  %v1450_v8 = vld [vmem:[#allocation5 + $0x244] ss:$8 sps:$4 sm:$0xff]   ;;  %v1517_v9 = vld [vmem:[#allocation5 + $0xd0] ss:$8 sps:$4 sm:$0xff]   ;;  %v1448_v11 = vld [vmem:[#allocation5 + $0x240] ss:$8 sps:$4 sm:$0xff]  }
  0x52   :  { %727 = vmatprep.subr.bf16.mxu1 %v1464_v35  ;;  %v1521_v10 = vld [vmem:[#allocation5 + $0xe4] ss:$8 sps:$4 sm:$0xff]   ;;  %v1456_v12 = vld [vmem:[#allocation5 + $0x254] ss:$8 sps:$4 sm:$0xff]   ;;  %v1526_v13 = vld [vmem:[#allocation5 + $0xe0] ss:$8 sps:$4 sm:$0xff]  }
  0x53   :  { %773 = vmatpush1.bf16.msra.mxu0 %v1397_v15  ;;  %v1527_v14 = vld [vmem:[#allocation5 + $0xf4] ss:$8 sps:$4 sm:$0xff]   ;;  %v1454_v15 = vld [vmem:[#allocation5 + $0x250] ss:$8 sps:$4 sm:$0xff]   ;;  %v1460_v17 = vld [vmem:[#allocation5 + $0x260] ss:$8 sps:$4 sm:$0xff]  }
  0x54   :  { %774 = vmatprep.subr.bf16.mxu0 %v1398_v16  ;;  %v1462_v16 = vld [vmem:[#allocation5 + $0x264] ss:$8 sps:$4 sm:$0xff]   ;;  %v1536_v21 = vld [vmem:[#allocation7 + $0x4] ss:$8 sps:$4 sm:$0xff]   ;;  %v1466_v24 = vld [vmem:[#allocation5 + $0x270] ss:$8 sps:$4 sm:$0xff]  }
  0x55   :  { %728 = vmatpush1.bf16.msra.mxu1 %v1469_v38  ;;  %v1530_v20 = vld [vmem:[#allocation3] ss:$28 sps:$4 sm:$0xff]   ;;  %v1542_v27 = vld [vmem:[#allocation7 + $0x24] ss:$8 sps:$4 sm:$0xff]   ;;  %v1540_v30 = vld [vmem:[#allocation7 + $0x20] ss:$8 sps:$4 sm:$0xff]  }
  0x56   :  { %729 = vmatprep.subr.bf16.mxu1 %v1470_v39  ;;  %v1539_v23 = vld [vmem:[#allocation7 + $0x14] ss:$8 sps:$4 sm:$0xff]   ;;  %v1537_v26 = vld [vmem:[#allocation7 + $0x10] ss:$8 sps:$4 sm:$0xff]   ;;  %v1548_v35 = vld [vmem:[#allocation7 + $0x44] ss:$8 sps:$4 sm:$0xff]  }
  0x57   :  { %775 = vmatpush1.bf16.msra.mxu0 %v1400_v18  ;;  %v1529_v18 = vld [vmem:[#allocation5 + $0xf0] ss:$8 sps:$4 sm:$0xff]   ;;  %v1545_v31 = vld [vmem:[#allocation7 + $0x34] ss:$8 sps:$4 sm:$0xff]   ;;  %v1543_v34 = vld [vmem:[#allocation7 + $0x30] ss:$8 sps:$4 sm:$0xff]  }
  0x58   :  { %776 = vmatprep.subr.bf16.mxu0 %v1401_v19  ;;  %v1468_v19 = vld [vmem:[#allocation5 + $0x274] ss:$8 sps:$4 sm:$0xff]   ;;  %v1546_v38 = vld [vmem:[#allocation7 + $0x40] ss:$8 sps:$4 sm:$0xff]   ;;  %v1551_v39 = vld [vmem:[#allocation7 + $0x54] ss:$8 sps:$4 sm:$0xff]  }
  0x59   :  { %730 = vmatpush1.bf16.msra.mxu1 %v1475_v42  ;;  %v1549_v42 = vld [vmem:[#allocation7 + $0x50] ss:$8 sps:$4 sm:$0xff]   ;;  %vm713_vm0 = vcmask 130048   ;;  %vm1205_vm9 = vcmask 7168  }
  0x5a   :  { %731 = vmatprep.subr.bf16.mxu1 %v1476_v43  ;;  %v1554_v43 = vld [vmem:[#allocation7 + $0x64] ss:$8 sps:$4 sm:$0xff]   ;;  %v1567_v1 = vld [vmem:[#allocation7 + $0xb0] ss:$8 sps:$4 sm:$0xff]  }
  0x5b   :  { %777 = vmatpush1.bf16.msra.mxu0 %v1403_v22  ;;  %v1534_v22 = vld [vmem:[#allocation7] ss:$8 sps:$4 sm:$0xff]  }
  0x5c   :  { %778 = vmatprep.subr.bf16.mxu0 %v1404_v25  ;;  %v1474_v25 = vld [vmem:[#allocation5 + $0x284] ss:$8 sps:$4 sm:$0xff]  }
  0x5d   :  { %732 = vmatpush1.bf16.msra.mxu1 %v1481_v46  ;;  %v1552_v46 = vld [vmem:[#allocation7 + $0x60] ss:$8 sps:$4 sm:$0xff]  }
  0x5e   :  { %733 = vmatprep.subr.bf16.mxu1 %v1482_v47  ;;  %v1557_v47 = vld [vmem:[#allocation7 + $0x74] ss:$8 sps:$4 sm:$0xff]  }
  0x5f   :  { %779 = vmatpush1.bf16.msra.mxu0 %v1406_v28  ;;  %v1472_v28 = vld [vmem:[#allocation5 + $0x280] ss:$8 sps:$4 sm:$0xff]  }
  0x60   :  { %780 = vmatprep.subr.bf16.mxu0 %v1407_v29  ;;  %v1480_v29 = vld [vmem:[#allocation5 + $0x294] ss:$8 sps:$4 sm:$0xff]  }
  0x61   :  { %734 = vmatpush1.bf16.msra.mxu1 %v1487_v50  ;;  %v1555_v50 = vld [vmem:[#allocation7 + $0x70] ss:$8 sps:$4 sm:$0xff]  }
  0x62   :  { %735 = vmatprep.subr.bf16.mxu1 %v1488_v51  ;;  %v1560_v51 = vld [vmem:[#allocation7 + $0x84] ss:$8 sps:$4 sm:$0xff]  }
  0x63   :  { %781 = vmatpush1.bf16.msra.mxu0 %v1409_v32  ;;  %v1478_v32 = vld [vmem:[#allocation5 + $0x290] ss:$8 sps:$4 sm:$0xff]  }
  0x64   :  { %782 = vmatprep.subr.bf16.mxu0 %v1410_v33  ;;  %v1486_v33 = vld [vmem:[#allocation5 + $0x2a4] ss:$8 sps:$4 sm:$0xff]  }
  0x65   :  { %736 = vmatpush1.bf16.msra.mxu1 %v1493_v54  ;;  %v1558_v54 = vld [vmem:[#allocation7 + $0x80] ss:$8 sps:$4 sm:$0xff]  }
  0x66   :  { %737 = vmatprep.subr.bf16.mxu1 %v1494_v56  ;;  %v1514_v56 = vld [vmem:[#allocation5 + $0x2f0] ss:$8 sps:$4 sm:$0xff]  }
  0x67   :  { %783 = vmatpush1.bf16.msra.mxu0 %v1412_v36  ;;  %v1484_v36 = vld [vmem:[#allocation5 + $0x2a0] ss:$8 sps:$4 sm:$0xff]  }
  0x68   :  { %784 = vmatprep.subr.bf16.mxu0 %v1413_v37  ;;  %v1492_v37 = vld [vmem:[#allocation5 + $0x2b4] ss:$8 sps:$4 sm:$0xff]  }
  0x69   :  { %738 = vmatpush1.bf16.msra.mxu1 %v1499_v60  ;;  %v1566_v60 = vld [vmem:[#allocation7 + $0xa4] ss:$8 sps:$4 sm:$0xff]  }
  0x6a   :  { %739 = vmatprep.subr.bf16.mxu1 %v1500_v61  ;;  %v1523_v61 = vld [vmem:[#allocation5 + $0x300] ss:$8 sps:$4 sm:$0xff]  }
  0x6b   :  { %785 = vmatpush1.bf16.msra.mxu0 %v1415_v40  ;;  %v1490_v40 = vld [vmem:[#allocation5 + $0x2b0] ss:$8 sps:$4 sm:$0xff]  }
  0x6c   :  { %786 = vmatprep.subr.bf16.mxu0 %v1416_v41  ;;  %v1498_v41 = vld [vmem:[#allocation5 + $0x2c4] ss:$8 sps:$4 sm:$0xff]  }
  0x6d   :  { %740 = vmatpush1.bf16.msra.mxu1 %v1505_v0  ;;  %v1667_v0 = vmov 0  }
  0x6e   :  { %741 = vmatprep.subr.bf16.mxu1 %v1506_v2  ;;  %v1533_v2 = vld [vmem:[#allocation3 + $0x18] ss:$28 sps:$4 sm:$0xff]  }
  0x6f   :  { %787 = vmatpush1.bf16.msra.mxu0 %v1418_v44  ;;  %v1496_v44 = vld [vmem:[#allocation5 + $0x2c0] ss:$8 sps:$4 sm:$0xff]  }
  0x70   :  { %788 = vmatprep.subr.bf16.mxu0 %v1419_v45  ;;  %v1504_v45 = vld [vmem:[#allocation5 + $0x2d4] ss:$8 sps:$4 sm:$0xff]  }
  0x71   :  { %742 = vmatpush1.bf16.msra.mxu1 %v1511_v5  ;;  %v1575_v5 = vld [vmem:[#allocation7 + $0xd4] ss:$8 sps:$4 sm:$0xff]  }
  0x72   :  { %743 = vmatprep.subr.bf16.mxu1 %v1512_v6  ;;  %v1573_v6 = vld [vmem:[#allocation7 + $0xd0] ss:$8 sps:$4 sm:$0xff]  }
  0x73   :  { %789 = vmatpush1.bf16.msra.mxu0 %v1421_v48  ;;  %v1502_v48 = vld [vmem:[#allocation5 + $0x2d0] ss:$8 sps:$4 sm:$0xff]  }
  0x74   :  { %790 = vmatprep.subr.bf16.mxu0 %v1422_v49  ;;  %v1510_v49 = vld [vmem:[#allocation5 + $0x2e4] ss:$8 sps:$4 sm:$0xff]  }
  0x75   :  { %744 = vmatpush1.bf16.msra.mxu1 %v1517_v9  ;;  %v1581_v9 = vld [vmem:[#allocation7 + $0xf4] ss:$8 sps:$4 sm:$0xff]  }
  0x76   :  { %745 = vmatprep.subr.bf16.mxu1 %v1521_v10  ;;  %v1579_v10 = vld [vmem:[#allocation7 + $0xf0] ss:$8 sps:$4 sm:$0xff]  }
  0x77   :  { %791 = vmatpush1.bf16.msra.mxu0 %v1424_v52  ;;  %v1508_v52 = vld [vmem:[#allocation5 + $0x2e0] ss:$8 sps:$4 sm:$0xff]  }
  0x78   :  { %803 = vmatprep.subr.bf16.mxu0 %v1430_v53  ;;  %v1516_v53 = vld [vmem:[#allocation5 + $0x2f4] ss:$8 sps:$4 sm:$0xff]  }
  0x79   :  { %746 = vmatpush1.bf16.msra.mxu1 %v1526_v13 }
  0x7a   :  { %793 = vmatmul.mubr.bf16.vlgmr.msra.gmra.mrb[0].mxu0 %v1425_v55  ;;  %747 = vmatprep.subr.bf16.mxu1 %v1527_v14  ;;  %v1563_v55 = vld [vmem:[#allocation7 + $0x94] ss:$8 sps:$4 sm:$0xff]  }
  0x7b   :  { %804 = vmatpush1.bf16.msra.mxu0 %v1428_v57  ;;  %835 = vmatprep.mubr.bf16.mxu0 %v1520_v58  ;;  %v1525_v57 = vld [vmem:[#allocation5 + $0x304] ss:$8 sps:$4 sm:$0xff]   ;;  %v1561_v58 = vld [vmem:[#allocation7 + $0x90] ss:$8 sps:$4 sm:$0xff]  }
  0x7c   :  { %805 = vmatprep.subr.bf16.mxu0 %v1433_v59  ;;  %v1518_v59 = vld [vmem:[#allocation3 + $0x10] ss:$28 sps:$4 sm:$0xff]  }
  0x7d   :  { %748 = vmatpush1.bf16.msra.mxu1 %v1529_v18  ;;  %v176_v18 = vld [vmem:[%s1770_s2] sm:$0x3] }
  0x7e   :  { %1107 = vmatprep.subr.bf16.mxu1 %v1536_v21 }
  0x7f   :  { %806 = vmatpush1.bf16.msra.mxu0 %v1431_v62  ;;  %v1564_v62 = vld [vmem:[#allocation7 + $0xa0] ss:$8 sps:$4 sm:$0xff]  }
  0x80   :  { %807 = vmatprep.subr.bf16.mxu0 %v1438_v63  ;;  %750 = vmatmul.mubr.bf16.vlgmr.msra.gmra.mrb[0].mxu1 %v1530_v20  ;;  %v1569_v63 = vld [vmem:[#allocation7 + $0xb4] ss:$8 sps:$4 sm:$0xff]  }
  0x81   :  { %1108 = vmatpush1.bf16.msra.mxu1 %v1534_v22 }
  0x82   :  { %1109 = vmatprep.subr.bf16.mxu1 %v1539_v23 }
  0x83   :  { %808 = vmatpush1.bf16.msra.mxu0 %v1436_v3  ;;  %v1570_v3 = vld [vmem:[#allocation7 + $0xc0] ss:$8 sps:$4 sm:$0xff]  }
  0x84   :  { %809 = vmatprep.subr.bf16.mxu0 %v1444_v4  ;;  %v1572_v4 = vld [vmem:[#allocation7 + $0xc4] ss:$8 sps:$4 sm:$0xff]  }
  0x85   :  { %1110 = vmatpush1.bf16.msra.mxu1 %v1537_v26 }
  0x86   :  { %1111 = vmatprep.subr.bf16.mxu1 %v1542_v27 }
  0x87   :  { %810 = vmatpush1.bf16.msra.mxu0 %v1442_v7  ;;  %v1578_v7 = vld [vmem:[#allocation7 + $0xe4] ss:$8 sps:$4 sm:$0xff]  }
  0x88   :  { %811 = vmatprep.subr.bf16.mxu0 %v1450_v8  ;;  %v1576_v8 = vld [vmem:[#allocation7 + $0xe0] ss:$8 sps:$4 sm:$0xff]  }
  0x89   :  { %1112 = vmatpush1.bf16.msra.mxu1 %v1540_v30 }
  0x8a   :  { %1113 = vmatprep.subr.bf16.mxu1 %v1545_v31 }
  0x8b   :  { %812 = vmatpush1.bf16.msra.mxu0 %v1448_v11 }
  0x8c   :  { %813 = vmatprep.subr.bf16.mxu0 %v1456_v12 }
  0x8d   :  { %1114 = vmatpush1.bf16.msra.mxu1 %v1543_v34 }
  0x8e   :  { %1115 = vmatprep.subr.bf16.mxu1 %v1548_v35 }
  0x8f   :  { %814 = vmatpush1.bf16.msra.mxu0 %v1454_v15  ;;  %v178_v15 = vlaneseq }
  0x90   :  { %815 = vmatprep.subr.bf16.mxu0 %v1462_v16 }
  0x91   :  { %1116 = vmatpush1.bf16.msra.mxu1 %v1546_v38  ;;  %v179_v16 = vshrl.u32 %v178_v15, 7 }
  0x92   :  { %1117 = vmatprep.subr.bf16.mxu1 %v1551_v39 }
  0x93   :  { %816 = vmatpush1.bf16.msra.mxu0 %v1460_v17  ;;  %v180_v17 = vsub.s32 0, %v179_v16 }
  0x94   :  { %817 = vmatprep.subr.bf16.mxu0 %v1468_v19  ;;  %v184_v19 = vsub.s32 1, %v179_v16 }
  0x95   :  { %1118 = vmatpush1.bf16.msra.mxu1 %v1549_v42  ;;  %v181_v20 = vrot.slane %v176_v18, %v180_v17 }
  0x96   :  { %1119 = vmatprep.subr.bf16.mxu1 %v1554_v43  ;;  %v185_v21 = vrot.slane %v176_v18, %v184_v19 }
  0x97   :  { %818 = vmatpush1.bf16.msra.mxu0 %v1466_v24 }
  0x98   :  { %819 = vmatprep.subr.bf16.mxu0 %v1474_v25 }
  0x99   :  { %1120 = vmatpush1.bf16.msra.mxu1 %v1552_v46 }
  0x9a   :  { %1121 = vmatprep.subr.bf16.mxu1 %v1557_v47  ;;  %v1162_v47 = vld [vmem:[%s1773_s5] sm:$0x3] }
  0x9b   :  { %820 = vmatpush1.bf16.msra.mxu0 %v1472_v28 }
  0x9c   :  { %821 = vmatprep.subr.bf16.mxu0 %v1480_v29 }
  0x9d   :  { %1122 = vmatpush1.bf16.msra.mxu1 %v1555_v50 }
  0x9e   :  { %1123 = vmatprep.subr.bf16.mxu1 %v1560_v51 }
  0x9f   :  { %822 = vmatpush1.bf16.msra.mxu0 %v1478_v32 }
  0xa0   :  { %823 = vmatprep.subr.bf16.mxu0 %v1486_v33 }
  0xa1   :  { %1124 = vmatpush1.bf16.msra.mxu1 %v1558_v54 }
  0xa2   :  { %1125 = vmatprep.subr.bf16.mxu1 %v1563_v55 }
  0xa3   :  { %824 = vmatpush1.bf16.msra.mxu0 %v1484_v36 }
  0xa4   :  { %825 = vmatprep.subr.bf16.mxu0 %v1492_v37 }
  0xa5   :  { %1126 = vmatpush1.bf16.msra.mxu1 %v1561_v58 }
  0xa6   :  { %1127 = vmatprep.subr.bf16.mxu1 %v1566_v60 }
  0xa7   :  { %826 = vmatpush1.bf16.msra.mxu0 %v1490_v40 }
  0xa8   :  { %827 = vmatprep.subr.bf16.mxu0 %v1498_v41 }
  0xa9   :  { %1128 = vmatpush1.bf16.msra.mxu1 %v1564_v62 }
  0xaa   :  { %1129 = vmatprep.subr.bf16.mxu1 %v1569_v63 }
  0xab   :  { %828 = vmatpush1.bf16.msra.mxu0 %v1496_v44  ;;  %v935_v44 = vld [vmem:[%s1772_s4] sm:$0x3] }
  0xac   :  { %829 = vmatprep.subr.bf16.mxu0 %v1504_v45  ;;  %v940_v45 = vrot.slane %v935_v44, %v180_v17  ;;  %v944_v46 = vrot.slane %v935_v44, %v184_v19 }
  0xad   :  { %1130 = vmatpush1.bf16.msra.mxu1 %v1567_v1 }
  0xae   :  { %1131 = vmatprep.subr.bf16.mxu1 %v1572_v4 }
  0xaf   :  { %830 = vmatpush1.bf16.msra.mxu0 %v1502_v48 }
  0xb0   :  { %831 = vmatprep.subr.bf16.mxu0 %v1510_v49 }
  0xb1   :  { %1132 = vmatpush1.bf16.msra.mxu1 %v1570_v3 }
  0xb2   :  { %1133 = vmatprep.subr.bf16.mxu1 %v1575_v5 }
  0xb3   :  { %832 = vmatpush1.bf16.msra.mxu0 %v1508_v52 }
  0xb4   :  { %833 = vmatprep.subr.bf16.mxu0 %v1516_v53  ;;  %v1167_v53 = vrot.slane %v1162_v47, %v180_v17 }
  0xb5   :  { %1134 = vmatpush1.bf16.msra.mxu1 %v1573_v6 }
  0xb6   :  { %1135 = vmatprep.subr.bf16.mxu1 %v1578_v7 }
  0xb7   :  { %834 = vmatpush1.bf16.msra.mxu0 %v1514_v56 }
  0xb8   :  { %846 = vmatprep.subr.bf16.mxu0 %v1525_v57  ;;  %v1171_v57 = vrot.slane %v1162_v47, %v184_v19 }
  0xb9   :  { %1136 = vmatpush1.bf16.msra.mxu1 %v1576_v8  ;;  %v1352_v8 = vld [vmem:[#allocation2] ss:$0 sm:$0xff] }
  0xba   :  { %836 = vmatmul.mubr.bf16.vlgmr.msra.gmra.mrb[0].mxu0 %v1518_v59  ;;  %1137 = vmatprep.subr.bf16.mxu1 %v1581_v9 }
  0xbb   :  { %847 = vmatpush1.bf16.msra.mxu0 %v1523_v61  ;;  %878 = vmatprep.mubr.bf16.mxu0 %v1667_v0 }
  0xbd   :  { %1138 = vmatpush1.bf16.msra.mxu1 %v1579_v10 }
  0xc6   :  { %1319 = vmatmul.mubr.msk.bf16.vlgmr.msra.gmra.mrb[0].mxu0 %vm713_vm0, %v1533_v2 }
 0x153   :  { %v751_v11 = vpop.f32.mrb[0].mxu1 }
 0x154   :  { %v753_v12 = vpop.f32.mrb[1].mxu1  ;;  %v752_v22 = vadd.f32 %v751_v11, %v181_v20 }
 0x155   :  { %v755_v13 = vpop.f32.mrb[2].mxu1  ;;  %v754_v23 = vadd.f32 %v753_v12, %v185_v21 }
 0x156   :  { %v757_v14 = vpop.f32.mrb[3].mxu1  ;;  %v756_v25 = vadd.f32 %v755_v13, %v181_v20 }
 0x157   :  { %v758_v28 = vadd.f32 %v757_v14, %v185_v21 }
 0x199   :  { %v880_v24 = vpop.f32.mrb[0].mxu0 }
 0x19a   :  { %v1354_v26 = vadd.f32 %v880_v24, %v752_v22  ;;  %v882_v27 = vpop.f32.mrb[1].mxu0 }
 0x19b   :  { %v1356_v29 = vadd.f32 %v882_v27, %v754_v23  ;;  %v884_v30 = vpop.f32.mrb[2].mxu0 }
 0x19c   :  { %v893_v31 = vmul.f32 0.2, %v1354_v26  ;;  %v1358_v32 = vadd.f32 %v884_v30, %v756_v25  ;;  %v886_v33 = vpop.f32.mrb[3].mxu0  ;;  %vm889_vm1 = vcmp.gt.f32.partialorder %v1354_v26, 0.0 }
 0x19d   :  { %v894_v34 = vmul.f32 0.2, %v1356_v29  ;;  %v1360_v35 = vadd.f32 %v886_v33, %v758_v28  ;;  %vm890_vm2 = vcmp.gt.f32.partialorder %v1356_v29, 0.0 }
 0x19e   :  { %vm891_vm3 = vcmp.gt.f32.partialorder %v1358_v32, 0.0  ;;  %v895_v36 = vmul.f32 0.2, %v1358_v32  ;;  %v897_v38 = vsel %vm889_vm1, %v1354_v26, %v893_v31 }
 0x19f   :  { %vm892_vm4 = vcmp.gt.f32.partialorder %v1360_v35, 0.0  ;;  %v896_v37 = vmul.f32 0.2, %v1360_v35  ;;  %v898_v41 = vsel %vm890_vm2, %v1356_v29, %v894_v34 }
 0x1a0   :  { %v899_v39 = vsel %vm891_vm3, %v1358_v32, %v895_v36 }
 0x1a1   :  { %v901_v40 = vpack.c.bf16 %v899_v39, %v897_v38  ;;  %v900_v42 = vsel %vm892_vm4, %v1360_v35, %v896_v37 }
 0x1a2   :  { %v902_v43 = vpack.c.bf16 %v900_v42, %v898_v41 }
 0x1a4   :  { %1139 = vmatprep.mubr.bf16.mxu1 %v902_v43 }
 0x1a5   :  { %1140 = vmatmul.mubr.bf16.vlgmr.msra.gmra.mrb[4].mxu1 %v901_v40 }
 0x278   :  { %v1141_v48 = vpop.f32.mrb[4].mxu1 }
 0x279   :  { %v1142_v49 = vadd.f32 %v1141_v48, %v940_v45  ;;  %v1143_v50 = vpop.f32.mrb[5].mxu1 }
 0x27a   :  { %v1144_v51 = vadd.f32 %v1143_v50, %v944_v46  ;;  %v1145_v52 = vpop.f32.mrb[6].mxu1 }
 0x27b   :  { %vm1150_vm5 = vcmp.gt.f32.partialorder %v1142_v49, 0.0  ;;  %v1154_v54 = vmul.f32 0.2, %v1142_v49  ;;  %v1146_v55 = vadd.f32 %v1145_v52, %v940_v45  ;;  %v1147_v56 = vpop.f32.mrb[7].mxu1 }
 0x27c   :  { %vm1151_vm6 = vcmp.gt.f32.partialorder %v1144_v51, 0.0  ;;  %v1155_v58 = vmul.f32 0.2, %v1144_v51  ;;  %v1148_v59 = vadd.f32 %v1147_v56, %v944_v46 }
 0x27d   :  { %vm1152_vm7 = vcmp.gt.f32.partialorder %v1146_v55, 0.0  ;;  %v1156_v60 = vmul.f32 0.2, %v1146_v55  ;;  %v1158_v61 = vsel %vm1150_vm5, %v1142_v49, %v1154_v54 }
 0x27e   :  { %vm1153_vm8 = vcmp.gt.f32.partialorder %v1148_v59, 0.0  ;;  %v1157_v62 = vmul.f32 0.2, %v1148_v59  ;;  %v1159_v63 = vsel %vm1151_vm6, %v1144_v51, %v1155_v58  ;;  %v1174_v0 = vmul.f32 %v1167_v53, %v1158_v61 }
 0x27f   :  { %v1175_v1 = vmul.f32 %v1171_v57, %v1159_v63  ;;  %v1160_v2 = vsel %vm1152_vm7, %v1146_v55, %v1156_v60 }
 0x280   :  { %v1161_v3 = vsel %vm1153_vm8, %v1148_v59, %v1157_v62  ;;  %v1176_v4 = vmul.f32 %v1167_v53, %v1160_v2 }
 0x281   :  { %v1178_v5 = vadd.f32 %v1175_v1, %v1174_v0  ;;  %v1177_v6 = vmul.f32 %v1171_v57, %v1161_v3 }
 0x283   :  { %1179 = vadd.xlane.f32.xlu0 %v1178_v5  ;;  %v1181_v7 = vadd.f32 %v1177_v6, %v1176_v4 }
 0x287   :  { %1182 = vadd.xlane.f32.xlu0 %v1181_v7 }
 0x310   :  { %v1180_v9 = vpop.xlane.xlu0 %1179 }
 0x311   :  { %v1191_v10 = vadd.f32 %v1352_v8, %v1180_v9 }
 0x313   :  { %v1193_v11 = vsub.f32 0.0, %v1191_v10 }
 0x314   :  { %v1183_v12 = vpop.xlane.xlu0 %1182 }
 0x315   :  { %v1195_v13 = vmul.f32 1.442695, %v1193_v11  ;;  %v1192_v14 = vadd.f32 %v1352_v8, %v1183_v12 }
 0x317   :  { %1582 = vpow2.f32 %v1195_v13  ;;  %v1194_v15 = vsub.f32 0.0, %v1192_v14 }
 0x319   :  { %v1197_v16 = vmul.f32 1.442695, %v1194_v15 }
 0x31b   :  { %1584 = vpow2.f32 %v1197_v16 }
 0x321   :  { %v1583_v17 = vpop.eup %1582 }
 0x322   :  { %v1199_v18 = vadd.f32 1.0, %v1583_v17 }
 0x324   :  { %1586 = vrcp.f32 %v1199_v18 }
 0x325   :  { %v1585_v19 = vpop.eup %1584 }
 0x326   :  { %v1200_v20 = vadd.f32 1.0, %v1585_v19 }
 0x328   :  { %1588 = vrcp.f32 %v1200_v20 }
 0x32e   :  { %v1587_v21 = vpop.eup %1586 }
 0x32f   :  { %1206 = vst.msk [vmem:[%s1775_s7] sm:$0xff] %vm1205_vm9, %v1587_v21 }
 0x332   :  { %v1589_v22 = vpop.eup %1588 }
 0x333   :  { %1207 = vst.msk [vmem:[%s1775_s7 + $0x8] sm:$0xff] %vm1205_vm9, %v1589_v22 }
 0x334   :  { %1212 = vsyncpa [#allocation4], 1 }
 0x335   :  { %1213 = vsyncpa [#allocation6], 1 }

</bundles_post_ra>
